<compile_context>
chip_gen: v6e
topology: v6e:2x2x1
jax: 0.10.0
libtpu: 0.0.40
codegen_flags: <defaults>
</compile_context>

<pallas_src>
import jax
import jax.numpy as jnp
from jax.experimental import pallas as pl
from jax.experimental.pallas import tpu as pltpu

# ----- module hyper-parameters (small, consistent with the torch module) -----
LATENT_DIM = 8
STATE_DIM = 10
ACTION_DIM = 4
STATE_EMBED_DIM = 16
ACTION_EMBED_DIM = 8
LAYERS = (32, 32)
OUT_DIM = STATE_DIM                                   # pred_type='deterministic'

BATCH = 16

IN_DIM = LATENT_DIM + STATE_DIM + ACTION_DIM          # 22 : [latent | state | actions]
XIN_DIM = IN_DIM + 2                                  # 24 : + [1.0 | 0.0] pad lanes
CAT_DIM = LATENT_DIM + STATE_EMBED_DIM + ACTION_EMBED_DIM   # 32 : [latent | hs | ha]

# ----- packed weight slab layout (one f32 slab, built once; 8-aligned blocks) -
SLAB_COLS = 32            # widest layer
R_WIN = 0                 # rows   0: 24  fused input-layer weight+bias (K=24)
R_W0 = 24                 # rows  24: 56  fc0 weight (32, 32)
R_W1 = 56                 # rows  56: 88  fc1 weight (32, 32)
R_WO = 88                 # rows  88:120  fc_out weight (32, 10) zero-padded to 32 cols
R_B0 = 120                # row  120      fc0 bias
R_B1 = 121                # row  121      fc1 bias
R_BO = 122                # row  122      fc_out bias zero-padded to 32 cols
SLAB_ROWS = 128           # rows 123:128 zero pad (multiple of 8)


def _decoder_kernel(x_ref, w_ref, out_ref):
    x = x_ref[...]                                        # (B, 24)

    # squash_action == tanh, applied only to the action lanes (cols 18:22);
    # the constant 1.0 / 0.0 pad lanes (22, 23) must stay untouched.
    col = jax.lax.broadcasted_iota(jnp.int32, x.shape, 1)
    act_lo = LATENT_DIM + STATE_DIM
    is_action = (col >= act_lo) & (col < act_lo + ACTION_DIM)
    x = jnp.where(is_action, jnp.tanh(x), x)

    # Fused first layer (single sublane-aligned K=24 matmul, bias folded in):
    #   output cols 0:8   = latent (identity pass-through)
    #   output cols 8:24  = state @ Ws + bs   (pre-relu hs)
    #   output cols 24:32 = tanh(a) @ Wa + ba (pre-relu ha)
    h = jnp.dot(x, w_ref[R_WIN:R_WIN + XIN_DIM, :],
                preferred_element_type=jnp.float32)
    hcol = jax.lax.broadcasted_iota(jnp.int32, h.shape, 1)
    h = jnp.where(hcol >= LATENT_DIM, jnp.maximum(h, 0.0), h)   # relu only on hs/ha

    # fc0 + relu (single K=32 matmul over [latent | hs | ha])
    h = jnp.maximum(
        jnp.dot(h, w_ref[R_W0:R_W0 + CAT_DIM, :],
                preferred_element_type=jnp.float32)
        + w_ref[R_B0:R_B0 + 1, :], 0.0)

    # fc1 + relu
    h = jnp.maximum(
        jnp.dot(h, w_ref[R_W1:R_W1 + LAYERS[0], :],
                preferred_element_type=jnp.float32)
        + w_ref[R_B1:R_B1 + 1, :], 0.0)

    # fc_out (no activation) — full lane-dense 32-column blocks; cols 10:32 are
    # zero-padded and sliced off in the wrapper.
    out = (jnp.dot(h, w_ref[R_WO:R_WO + LAYERS[1], :],
                   preferred_element_type=jnp.float32)
           + w_ref[R_BO:R_BO + 1, :])
    out_ref[...] = out.astype(out_ref.dtype)


def pack_params(p):
    """Pack all weights & biases into one f32 slab (128, 32). Call ONCE per
    parameter update, not per forward call."""
    def pad_cols(a):
        return jnp.pad(a, ((0, 0), (0, SLAB_COLS - a.shape[1])))

    # Block-diagonal fused input-layer weight with bias folded into row 22:
    #   rows  0: 8  -> identity (latent pass-through)
    #   rows  8:18  -> Ws  (state encoder)
    #   rows 18:22  -> Wa  (action encoder)
    #   row  22     -> [0 | bs | ba]   (multiplied by the constant-1 input lane)
    #   row  23     -> 0               (matches the constant-0 input lane)
    w_in = jnp.zeros((R_W0 - R_WIN, SLAB_COLS), jnp.float32)
    w_in = w_in.at[0:LATENT_DIM, 0:LATENT_DIM].set(
        jnp.eye(LATENT_DIM, dtype=jnp.float32))
    w_in = w_in.at[LATENT_DIM:LATENT_DIM + STATE_DIM,
                   LATENT_DIM:LATENT_DIM + STATE_EMBED_DIM].set(p["ws"])
    w_in = w_in.at[LATENT_DIM + STATE_DIM:IN_DIM,
                   LATENT_DIM + STATE_EMBED_DIM:CAT_DIM].set(p["wa"])
    w_in = w_in.at[IN_DIM:IN_DIM + 1,
                   LATENT_DIM:LATENT_DIM + STATE_EMBED_DIM].set(p["bs"])
    w_in = w_in.at[IN_DIM:IN_DIM + 1,
                   LATENT_DIM + STATE_EMBED_DIM:CAT_DIM].set(p["ba"])

    slab = jnp.concatenate([
        w_in,                        # rows   0: 24
        p["w0"],                     # rows  24: 56
        p["w1"],                     # rows  56: 88
        pad_cols(p["wo"]),           # rows  88:120
        p["b0"],                     # row  120
        p["b1"],                     # row  121
        pad_cols(p["bo"]),           # row  122
        jnp.zeros((SLAB_ROWS - (R_BO + 1), SLAB_COLS), jnp.float32),
    ], axis=0)
    assert slab.shape == (SLAB_ROWS, SLAB_COLS)
    return slab


@jax.jit
def decoder_forward(latent, state, actions, w_slab):
    """w_slab is the cached result of pack_params(params)."""
    B = latent.shape[0]
    # Wrapper-side layout plumbing only: one activation slab (with the constant
    # 1/0 lanes for the folded first-layer bias) + the cached weight slab.
    x_in = jnp.concatenate(
        [latent, state, actions,
         jnp.ones((B, 1), jnp.float32), jnp.zeros((B, 1), jnp.float32)],
        axis=-1)                                                 # (B, 24)

    out32 = pl.pallas_call(
        _decoder_kernel,
        out_shape=jax.ShapeDtypeStruct((B, SLAB_COLS), jnp.float32),
        in_specs=[
            pl.BlockSpec(memory_space=pltpu.MemorySpace.VMEM),
            pl.BlockSpec(memory_space=pltpu.MemorySpace.VMEM),
        ],
        out_specs=pl.BlockSpec(memory_space=pltpu.MemorySpace.VMEM),
    )(x_in, w_slab)
    return out32[:, :OUT_DIM]


def ref_forward(latent, state, actions, p):
    """Pure-JAX reference matching the torch forward."""
    a = jnp.tanh(actions)
    ha = jax.nn.relu(a @ p["wa"] + p["ba"])
    hs = jax.nn.relu(state @ p["ws"] + p["bs"])
    h = jnp.concatenate([latent, hs, ha], axis=-1)
    h = jax.nn.relu(h @ p["w0"] + p["b0"])
    h = jax.nn.relu(h @ p["w1"] + p["b1"])
    return h @ p["wo"] + p["bo"]


def init_params(key):
    ks = jax.random.split(key, 10)
    s = 0.1
    return {
        "wa": s * jax.random.normal(ks[0], (ACTION_DIM, ACTION_EMBED_DIM), jnp.float32),
        "ba": s * jax.random.normal(ks[1], (1, ACTION_EMBED_DIM), jnp.float32),
        "ws": s * jax.random.normal(ks[2], (STATE_DIM, STATE_EMBED_DIM), jnp.float32),
        "bs": s * jax.random.normal(ks[3], (1, STATE_EMBED_DIM), jnp.float32),
        "w0": s * jax.random.normal(ks[4], (CAT_DIM, LAYERS[0]), jnp.float32),
        "b0": s * jax.random.normal(ks[5], (1, LAYERS[0]), jnp.float32),
        "w1": s * jax.random.normal(ks[6], (LAYERS[0], LAYERS[1]), jnp.float32),
        "b1": s * jax.random.normal(ks[7], (1, LAYERS[1]), jnp.float32),
        "wo": s * jax.random.normal(ks[8], (LAYERS[1], OUT_DIM), jnp.float32),
        "bo": s * jax.random.normal(ks[9], (1, OUT_DIM), jnp.float32),
    }


if __name__ == "__main__":
    key = jax.random.PRNGKey(0)
    kp, kl, ksd, ka = jax.random.split(key, 4)

    params = init_params(kp)
    # Pack once (parameter-update time), reuse across all forward calls.
    w_slab = jax.block_until_ready(pack_params(params))

    latent = jax.random.normal(kl, (BATCH, LATENT_DIM), jnp.float32)
    state = jax.random.normal(ksd, (BATCH, STATE_DIM), jnp.float32)
    actions = jax.random.normal(ka, (BATCH, ACTION_DIM), jnp.float32)

    out = decoder_forward(latent, state, actions, w_slab)
    out = jax.block_until_ready(out)

    ref = ref_forward(latent, state, actions, params)
    assert out.shape == (BATCH, OUT_DIM)
    assert jnp.allclose(out, ref, atol=1e-3, rtol=1e-3), "mismatch vs JAX reference"

    print("KERNEL_OK")
</pallas_src>

<mosaic_0001>
module attributes {stable_mosaic.version = 11 : i64} {
  func.func @_decoder_kernel(%arg0: memref<16x24xf32, #tpu.memory_space<vmem>>, %arg1: memref<128x32xf32, #tpu.memory_space<vmem>>, %arg2: memref<16x32xf32, #tpu.memory_space<vmem>>) attributes {dimension_semantics = [], scalar_prefetch = 0 : i64, scratch_operands = 0 : i64, tpu.core_type = #tpu.core_type<tc>} {
    %c0 = arith.constant 0 : index
    %c0_0 = arith.constant 0 : index
    %0 = vector.load %arg0[%c0, %c0_0] : memref<16x24xf32, #tpu.memory_space<vmem>>, vector<16x24xf32>
    %1 = tpu.iota {dimensions = array<i32: 1>} : vector<16x24xi32>
    %c18_i32 = arith.constant 18 : i32
    %2 = vector.broadcast %c18_i32 : i32 to vector<16x24xi32>
    %3 = arith.cmpi sge, %1, %2 : vector<16x24xi32>
    %c22_i32 = arith.constant 22 : i32
    %4 = vector.broadcast %c22_i32 : i32 to vector<16x24xi32>
    %5 = arith.cmpi slt, %1, %4 : vector<16x24xi32>
    %6 = arith.andi %3, %5 : vector<16x24xi1>
    %7 = math.tanh %0 : vector<16x24xf32>
    %8 = arith.select %6, %7, %0 : vector<16x24xi1>, vector<16x24xf32>
    %c0_1 = arith.constant 0 : index
    %c0_2 = arith.constant 0 : index
    %9 = vector.load %arg1[%c0_1, %c0_2] : memref<128x32xf32, #tpu.memory_space<vmem>>, vector<24x32xf32>
    %cst = arith.constant dense<0.000000e+00> : vector<16x32xf32>
    %10 = tpu.matmul %8, %9, %cst {dimension_numbers = #tpu.dot_dimension_numbers<[1], [0], [0], [1], [0, 0, 1, 1], [], []>} : vector<16x24xf32>, vector<24x32xf32>, vector<16x32xf32> -> vector<16x32xf32>
    %11 = tpu.iota {dimensions = array<i32: 1>} : vector<16x32xi32>
    %c8_i32 = arith.constant 8 : i32
    %12 = vector.broadcast %c8_i32 : i32 to vector<16x32xi32>
    %13 = arith.cmpi sge, %11, %12 : vector<16x32xi32>
    %cst_3 = arith.constant 0.000000e+00 : f32
    %14 = vector.broadcast %cst_3 : f32 to vector<16x32xf32>
    %15 = arith.maximumf %10, %14 : vector<16x32xf32>
    %16 = arith.select %13, %15, %10 : vector<16x32xi1>, vector<16x32xf32>
    %c24 = arith.constant 24 : index
    %c0_4 = arith.constant 0 : index
    %17 = vector.load %arg1[%c24, %c0_4] : memref<128x32xf32, #tpu.memory_space<vmem>>, vector<32x32xf32>
    %cst_5 = arith.constant dense<0.000000e+00> : vector<16x32xf32>
    %18 = tpu.matmul %16, %17, %cst_5 {dimension_numbers = #tpu.dot_dimension_numbers<[1], [0], [0], [1], [0, 0, 1, 1], [], []>} : vector<16x32xf32>, vector<32x32xf32>, vector<16x32xf32> -> vector<16x32xf32>
    %c120 = arith.constant 120 : index
    %c0_6 = arith.constant 0 : index
    %19 = vector.load %arg1[%c120, %c0_6] : memref<128x32xf32, #tpu.memory_space<vmem>>, vector<1x32xf32>
    %20 = vector.broadcast %19 : vector<1x32xf32> to vector<16x32xf32>
    %21 = arith.addf %18, %20 : vector<16x32xf32>
    %cst_7 = arith.constant 0.000000e+00 : f32
    %22 = vector.broadcast %cst_7 : f32 to vector<16x32xf32>
    %23 = arith.maximumf %21, %22 : vector<16x32xf32>
    %c56 = arith.constant 56 : index
    %c0_8 = arith.constant 0 : index
    %24 = vector.load %arg1[%c56, %c0_8] : memref<128x32xf32, #tpu.memory_space<vmem>>, vector<32x32xf32>
    %cst_9 = arith.constant dense<0.000000e+00> : vector<16x32xf32>
    %25 = tpu.matmul %23, %24, %cst_9 {dimension_numbers = #tpu.dot_dimension_numbers<[1], [0], [0], [1], [0, 0, 1, 1], [], []>} : vector<16x32xf32>, vector<32x32xf32>, vector<16x32xf32> -> vector<16x32xf32>
    %c121 = arith.constant 121 : index
    %c0_10 = arith.constant 0 : index
    %26 = vector.load %arg1[%c121, %c0_10] : memref<128x32xf32, #tpu.memory_space<vmem>>, vector<1x32xf32>
    %27 = vector.broadcast %26 : vector<1x32xf32> to vector<16x32xf32>
    %28 = arith.addf %25, %27 : vector<16x32xf32>
    %cst_11 = arith.constant 0.000000e+00 : f32
    %29 = vector.broadcast %cst_11 : f32 to vector<16x32xf32>
    %30 = arith.maximumf %28, %29 : vector<16x32xf32>
    %c88 = arith.constant 88 : index
    %c0_12 = arith.constant 0 : index
    %31 = vector.load %arg1[%c88, %c0_12] : memref<128x32xf32, #tpu.memory_space<vmem>>, vector<32x32xf32>
    %cst_13 = arith.constant dense<0.000000e+00> : vector<16x32xf32>
    %32 = tpu.matmul %30, %31, %cst_13 {dimension_numbers = #tpu.dot_dimension_numbers<[1], [0], [0], [1], [0, 0, 1, 1], [], []>} : vector<16x32xf32>, vector<32x32xf32>, vector<16x32xf32> -> vector<16x32xf32>
    %c122 = arith.constant 122 : index
    %c0_14 = arith.constant 0 : index
    %33 = vector.load %arg1[%c122, %c0_14] : memref<128x32xf32, #tpu.memory_space<vmem>>, vector<1x32xf32>
    %34 = vector.broadcast %33 : vector<1x32xf32> to vector<16x32xf32>
    %35 = arith.addf %32, %34 : vector<16x32xf32>
    %c0_15 = arith.constant 0 : index
    %c0_16 = arith.constant 0 : index
    %36 = vector.load %arg2[%c0_15, %c0_16] : memref<16x32xf32, #tpu.memory_space<vmem>>, vector<16x32xf32>
    tpu.vector_store %arg2[%c0_15, %c0_16], %35 {strides = array<i32>} : memref<16x32xf32, #tpu.memory_space<vmem>>, vector<16x32xf32>,
    return
  }
}

</mosaic_0001>

<bundles_post_ra>
// kernel: decoder_forward.1
= control target key start
LH: loop header
LB: loop body
LE: loop exit
PB: predicated region body
PF: predicated region fallthrough
CT: control target
= control target key end

     0   :  { %v14_v6 = vlaneseq  ;;  %s600_s0 = inlined_call_operand.vmem [shape: f32[16,24], index: 0, kind: input, shape index: {}]   ;;  %s601_s1 = inlined_call_operand.vmem [shape: f32[128,32], index: 1, kind: input, shape index: {}]   ;;  %s602_s2 = inlined_call_operand.hbm [shape: f32[16,32], index: 2, kind: output, shape index: {}]  }
   0x1   :  { %v25_v0 = vld [vmem:[%s601_s1 + $0x10] sm:$0xff]  ;;  %v24_v1 = vld [vmem:[%s601_s1 + $0x8] sm:$0xff]  ;;  %v12_v2 = vld [vmem:[%s600_s0] sm:$0xff] }
   0x2   :  { %440 = vmatprep.subr.mxu0 %v25_v0  ;;  %v13_v3 = vld [vmem:[%s600_s0 + $0x8] sm:$0xff]  ;;  %v116_v4 = vld [vmem:[%s601_s1 + $0x30] sm:$0xff]  ;;  %v23_v5 = vld [vmem:[%s601_s1] sm:$0xff]  ;;  %485 = vtanh.f32 %v12_v2 }
   0x3   :  { %441 = vmatpush3.msra.mxu0 %v25_v0  ;;  %449 = vmatprep.subr.mxu1 %v116_v4 }
   0x4   :  { %7 = vsyncpa [#allocation3], 0  ;;  %442 = vmatprep.subr.mxu0 %v24_v1  ;;  %487 = vtanh.f32 %v13_v3  ;;  %450 = vmatpush3.msra.mxu1 %v116_v4  ;;  %v15_v7 = vand.u32 127, %v14_v6  ;;  %vm26_vm3 = vcmask 195584   ;;  %v115_v12 = vld [vmem:[%s601_s1 + $0x28] sm:$0xff]  ;;  %v114_v13 = vld [vmem:[%s601_s1 + $0x20] sm:$0xff] }
   0x5   :  { %443 = vmatpush3.msra.mxu0 %v24_v1  ;;  %451 = vmatprep.subr.mxu1 %v115_v12  ;;  %v113_v14 = vld [vmem:[%s601_s1 + $0x18] sm:$0xff]  ;;  %vm122_vm5 = vcmask 261120   ;;  %v209_v21 = vld [vmem:[%s601_s1 + $0x50] sm:$0xff]  ;;  %v208_v22 = vld [vmem:[%s601_s1 + $0x48] sm:$0xff]  ;;  %s511_s20 = smov [#allocation2]  }
   0x6   :  { %444 = vmatprep.subr.mxu0 %v23_v5  ;;  %vm16_vm0 = vcmp.ge.s32.totalorder %v15_v7, 18  ;;  %vm17_vm1 = vcmp.lt.s32.totalorder %v15_v7, 22  ;;  %452 = vmatpush3.msra.mxu1 %v115_v12  ;;  %vm108_vm4 = vcmp.ge.s32.totalorder %v15_v7, 8  ;;  %v207_v23 = vld [vmem:[%s601_s1 + $0x40] sm:$0xff]  ;;  %v206_v24 = vld [vmem:[%s601_s1 + $0x38] sm:$0xff]  ;;  %v301_v32 = vld [vmem:[%s601_s1 + $0x70] sm:$0xff] }
   0x7   :  { %445 = vmatpush3.msra.mxu0 %v23_v5  ;;  %vm18_vm2 = vmand %vm16_vm0, %vm17_vm1  ;;  %453 = vmatprep.subr.mxu1 %v114_v13  ;;  %v408_v25 = vld [vmem:[%s601_s1 + $0x78] ss:$0 sm:$0xff]  ;;  %v300_v33 = vld [vmem:[%s601_s1 + $0x68] sm:$0xff]  ;;  %s395_s0 = sshll.u32 %s511_s20, 4  ;;  %s396_s0 = int_to_ptr.vmem [resolvable:$true] %s395_s0 }
   0x8   :  { %454 = vmatpush3.msra.mxu1 %v114_v13  ;;  %460 = vmatprep.subr.mxu0 %v209_v21  ;;  %v299_v34 = vld [vmem:[%s601_s1 + $0x60] sm:$0xff]  ;;  %v298_v35 = vld [vmem:[%s601_s1 + $0x58] sm:$0xff]  ;;  %s489_s21 = scalar_lea.vmem %s396_s0, 256  ;;  %p494_p1 = scmp.lt.s32.totalorder %s396_s0, %s396_s0 }
   0x9   :  { %455 = vmatprep.subr.mxu1 %v113_v14  ;;  %v411_v36 = vld [vmem:[%s601_s1 + $0x79] ss:$0 sm:$0xff]  ;;  %v414_v43 = vld [vmem:[%s601_s1 + $0x7a] ss:$0 sm:$0xff]  ;;  %p490_p0 = scmp.ne.s32.totalorder %s396_s0, %s489_s21  ;;  %p495_p2 = scmp.lt.s32.totalorder %s489_s21, %s489_s21 }
   0xa   :  { %456 = vmatpush3.msra.mxu1 %v113_v14 }
   0xb   :  { %471 = vmatprep.subr.mxu1 %v301_v32  ;;  %p496_p3 = por %p495_p2, %p494_p1 }
   0xd   :  { %p497_p4 = pnand %p496_p3, %p490_p0 }
   0xf   :  { %v486_v8 = vpop.eup %485 }
  0x10   :  { %v21_v10 = vsel %vm18_vm2, %v486_v8, %v12_v2 }
  0x11   :  { %v488_v9 = vpop.eup %487  ;;  %446 = vmatprep.mubr.msk.f32.mxu0 %vm26_vm3, %v21_v10 }
  0x12   :  { %v22_v11 = vsel %vm18_vm2, %v488_v9, %v13_v3 }
  0x13   :  { %447 = vmatmul.mubr.msk.f32.vlgmr.msra.gmra.mxu0 %vm26_vm3, %v22_v11 }
  0x14   :  { %461 = vmatpush3.msra.mxu0 %v209_v21 }
  0x15   :  { %462 = vmatprep.subr.mxu0 %v208_v22 }
  0x16   :  { %463 = vmatpush3.msra.mxu0 %v208_v22 }
  0x17   :  { %464 = vmatprep.subr.mxu0 %v207_v23 }
  0x18   :  { %465 = vmatpush3.msra.mxu0 %v207_v23 }
  0x19   :  { %466 = vmatprep.subr.mxu0 %v206_v24 }
  0x1a   :  { %467 = vmatpush3.msra.mxu0 %v206_v24 }
  0xd3   :  { %v448_v15 = vpop.f32.mrf.mxu0 }
  0xd4   :  { %v110_v16 = vmax.f32 %v448_v15, 0.0 }
  0xd5   :  { %v99_v17 = vpop.f32.mrf.mxu0 }
  0xd6   :  { %v109_v18 = vmax.f32 %v99_v17, 0.0  ;;  %v112_v20 = vsel %vm108_vm4, %v110_v16, %v448_v15 }
  0xd8   :  { %v111_v19 = vsel %vm108_vm4, %v109_v18, %v99_v17 }
  0xd9   :  { %457 = vmatprep.mubr.msk.f32.mxu1 %vm122_vm5, %v111_v19 }
  0xda   :  { %458 = vmatmul.mubr.msk.f32.vlgmr.msra.gmra.mxu1 %vm122_vm5, %v112_v20 }
  0xdb   :  { %472 = vmatpush3.msra.mxu1 %v301_v32 }
  0xdc   :  { %473 = vmatprep.subr.mxu1 %v300_v33 }
  0xdd   :  { %474 = vmatpush3.msra.mxu1 %v300_v33 }
  0xde   :  { %475 = vmatprep.subr.mxu1 %v299_v34 }
  0xdf   :  { %476 = vmatpush3.msra.mxu1 %v299_v34 }
  0xe0   :  { %477 = vmatprep.subr.mxu1 %v298_v35 }
  0xe1   :  { %478 = vmatpush3.msra.mxu1 %v298_v35 }
 0x19a   :  { %v459_v26 = vpop.f32.mrf.mxu1 }
 0x19b   :  { %v201_v27 = vadd.f32 %v459_v26, %v408_v25 }
 0x19c   :  { %v195_v28 = vpop.f32.mrf.mxu1 }
 0x19d   :  { %v196_v29 = vadd.f32 %v408_v25, %v195_v28  ;;  %v205_v31 = vmax.f32 %v201_v27, 0.0 }
 0x19f   :  { %v204_v30 = vmax.f32 %v196_v29, 0.0 }
 0x1a1   :  { %468 = vmatprep.mubr.msk.f32.mxu0 %vm122_vm5, %v204_v30 }
 0x1a2   :  { %469 = vmatmul.mubr.msk.f32.vlgmr.msra.gmra.mxu0 %vm122_vm5, %v205_v31 }
 0x262   :  { %v470_v37 = vpop.f32.mrf.mxu0 }
 0x263   :  { %v293_v38 = vadd.f32 %v470_v37, %v411_v36 }
 0x264   :  { %v287_v39 = vpop.f32.mrf.mxu0 }
 0x265   :  { %v288_v40 = vadd.f32 %v411_v36, %v287_v39  ;;  %v297_v42 = vmax.f32 %v293_v38, 0.0 }
 0x267   :  { %v296_v41 = vmax.f32 %v288_v40, 0.0 }
 0x269   :  { %479 = vmatprep.mubr.msk.f32.mxu1 %vm122_vm5, %v296_v41 }
 0x26a   :  { %480 = vmatmul.mubr.msk.f32.vlgmr.msra.gmra.mxu1 %vm122_vm5, %v297_v42 }
 0x32a   :  { %v481_v44 = vpop.f32.mrf.mxu1 }
 0x32b   :  { %v385_v45 = vadd.f32 %v481_v44, %v414_v43 }
 0x32c   :  { %v379_v46 = vpop.f32.mrf.mxu1 }
 0x32d   :  { %389 = vst.msk [vmem:[#allocation2 + $0x8] sm:$0xff] %vm122_vm5, %v385_v45  ;;  %v380_v47 = vadd.f32 %v414_v43, %v379_v46 }
 0x32f   :  { %388 = vst.msk [vmem:[#allocation2] sm:$0xff] %vm122_vm5, %v380_v47 }
 0x330   :  { %500 = shalt.err (!%p497_p4)
}
 0x331   :  { %s512_s22 = smov 128   ;;  %s513_s1 = smov 8  }
 0x332   :  { %401 = dma.vmem_to_hbm [thread:$0]  %s396_s0, 256, %s602_s2, [#allocation3], %s512_s22, %s512_s22, %s513_s1  }
 0x333   :  { %509 = dma.done.wait [#allocation3], 256  }
 0x334   :  { %510 = vsyncadd [#allocation3], 4294967040 }
 0x335   :  { %405 = vsyncpa [#allocation3], 1 }

</bundles_post_ra>
